<compile_context>
chip_gen: v6e
topology: v6e:2x2x1
jax: 0.10.0
libtpu: 0.0.40
codegen_flags: <defaults>
</compile_context>

<pallas_src>
import functools
import math

import jax
import jax.numpy as jnp
from jax.experimental import pallas as pl
from jax.experimental.pallas import tpu as pltpu


def _round_up(a: int, b: int) -> int:
    return ((a + b - 1) // b) * b


def _vmem_capacity_bytes() -> int:
    """Per-core VMEM capacity; conservative 64 MiB (v7x) fallback."""
    try:
        info = pltpu.get_tpu_info()
        cap = getattr(info, "vmem_capacity_bytes", None)
        if cap:
            return int(cap)
    except Exception:
        pass
    return 64 << 20


def _sublane_multiple(dtype) -> int:
    # f32 -> 8 sublanes, bf16 -> 16, int8/fp8 -> 32 (native packed tile heights)
    return max(8, 32 // jnp.dtype(dtype).itemsize)


def _tile_footprint(tm: int, th: int, D: int,
                    x_item: int, w_item: int, out_item: int) -> int:
    """Approximate VMEM bytes for one grid step (double-buffered blocks + scratch)."""
    x_blk = 2 * tm * D * x_item            # x tile (double buffered)
    wg_blk = 2 * D * (2 * th) * w_item     # fused gate-weight tile
    w2_blk = 2 * th * D * w_item           # out-projection weight tile
    out_blk = 2 * tm * D * out_item        # output tile
    acc = tm * D * 4                       # f32 accumulator scratch
    interm = tm * (3 * th) * 4             # hg (tm,2th) + act (tm,th) f32 temporaries
    bias = 2 * (2 * th + D) * 4
    return x_blk + wg_blk + w2_blk + out_blk + acc + interm + bias


def _choose_th(H: int, D: int, vmem_capacity: int, w_item: int) -> int:
    """Hidden-dim tile: lane-aligned, double-buffered weight tiles <= ~40% of VMEM."""
    if H <= 512:
        return H                           # single H tile -> full-extent blocks
    th = 1024 if (vmem_capacity >= (96 << 20) and H % 1024 == 0) else 512
    budget = int(0.4 * vmem_capacity)
    while th > 128 and 2 * (3 * th * D) * w_item > budget:
        th //= 2
    return th


_TM_CANDIDATES = (1024, 768, 512, 384, 256, 192, 128, 96, 64, 32, 16, 8)


def _choose_tm(M: int, D: int, th: int, budget: int,
               x_item: int, w_item: int, out_item: int, sub: int) -> int:
    """Largest token tile whose footprint fits the VMEM budget (weights are
    re-streamed per token tile, so arithmetic intensity ~ tm flops/weight-byte)."""
    m_cap = _round_up(max(M, 1), sub)
    for cand in _TM_CANDIDATES:
        tm = max(sub, _round_up(min(cand, m_cap), sub))
        if _tile_footprint(tm, th, D, x_item, w_item, out_item) <= budget:
            return tm
    return sub


def _swiglu_kernel(x_ref, wg_ref, bg_ref, w2_ref, b2_ref, o_ref, acc_ref, *, th):
    # x_ref : (tm, D)      token tile (input dtype; cast to matmul dtype in-kernel)
    # wg_ref: (D, 2*th)    fused gate-weight tile, columns = [h_tile | g_tile]
    # bg_ref: (1, 2*th)    fused gate bias tile (f32)
    # w2_ref: (th, D)      output-projection weight tile (matmul dtype)
    # b2_ref: (1, D)       output bias (f32)
    # o_ref : (tm, D)      output tile (written once, at the last H step)
    # acc_ref: (tm, D) f32 VMEM accumulator, resident across the H grid axis
    j = pl.program_id(1)

    @pl.when(j == 0)
    def _init():
        acc_ref[...] = jnp.zeros_like(acc_ref)

    # Per-tile cast (no wrapper-side HBM pass over the activations).
    x = x_ref[...].astype(wg_ref.dtype)
    # Single fused gate matmul: (tm, D) @ (D, 2*th) -> f32, then static, lane-aligned split.
    hg = jnp.dot(x, wg_ref[...], preferred_element_type=jnp.float32) + bg_ref[...]
    h = hg[:, :th]
    g = hg[:, th:]
    # SwiGLU activation in f32 (VPU/EUP).
    act = h * (g * jax.nn.sigmoid(g))
    # Output projection, accumulated over H tiles in f32.
    acc_ref[...] += jnp.dot(act.astype(w2_ref.dtype), w2_ref[...],
                            preferred_element_type=jnp.float32)

    @pl.when(j == pl.num_programs(1) - 1)
    def _finalize():
        o_ref[...] = (acc_ref[...] + b2_ref[...]).astype(o_ref.dtype)


def prepare_swiglu_params(w_gate, b_gate, w_out, b_out, *,
                          th=None, matmul_dtype=jnp.bfloat16):
    """One-time weight preparation (call once at init, NOT per forward).

    w_gate: (2*H, D) PyTorch nn.Linear layout, b_gate: (2*H,)
    w_out : (D, H),  b_out: (D,)
    """
    H2, D = w_gate.shape
    H = H2 // 2
    w_item = jnp.dtype(matmul_dtype).itemsize
    vmem_capacity = _vmem_capacity_bytes()
    if th is None:
        th = _choose_th(H, D, vmem_capacity, w_item)

    # Zero-pad H to a multiple of th: padded h columns (weights AND bias) are zero,
    # so act == 0 there; padded w_out rows are zero, so the output is unchanged.
    Hp = _round_up(H, th)
    nH = Hp // th
    pad = Hp - H

    w_h = jnp.transpose(w_gate[:H, :])       # (D, H) -> "x" half
    w_g = jnp.transpose(w_gate[H:, :])       # (D, H) -> "gate" half
    b_h = b_gate[:H]
    b_g = b_gate[H:]
    w2 = jnp.transpose(w_out)                # (H, D)
    if pad:
        w_h = jnp.pad(w_h, ((0, 0), (0, pad)))
        w_g = jnp.pad(w_g, ((0, 0), (0, pad)))
        b_h = jnp.pad(b_h, (0, pad))
        b_g = jnp.pad(b_g, (0, pad))
        w2 = jnp.pad(w2, ((0, pad), (0, 0)))

    # Interleave per-H-tile so block j (width 2*th) is [h_tile_j | g_tile_j].
    w_gate_fused = jnp.concatenate(
        [w_h.reshape(D, nH, th), w_g.reshape(D, nH, th)], axis=2
    ).reshape(D, 2 * Hp)
    b_gate_fused = jnp.concatenate(
        [b_h.reshape(nH, th), b_g.reshape(nH, th)], axis=1
    ).reshape(1, 2 * Hp)

    return dict(
        w_gate=w_gate_fused.astype(matmul_dtype),   # (D, 2*Hp)
        b_gate=b_gate_fused.astype(jnp.float32),    # (1, 2*Hp)
        w_out=w2.astype(matmul_dtype),              # (Hp, D)
        b_out=b_out.reshape(1, D).astype(jnp.float32),
        D=D, H=H, Hp=Hp, th=th,
        matmul_dtype=matmul_dtype,
        vmem_capacity=vmem_capacity,
    )


def swiglu_pallas(x, params, *, tm=None, vmem_limit_bytes=None):
    """x: (..., D). params: output of prepare_swiglu_params."""
    D, Hp, th = params["D"], params["Hp"], params["th"]
    mm_dtype = params["matmul_dtype"]
    vmem_cap = params["vmem_capacity"]
    out_dtype = x.dtype
    orig_shape = x.shape
    assert orig_shape[-1] == D

    xm = x.reshape(-1, D)                    # no wrapper-side cast or pad
    M = xm.shape[0]

    x_item = jnp.dtype(xm.dtype).itemsize
    w_item = jnp.dtype(mm_dtype).itemsize
    out_item = jnp.dtype(out_dtype).itemsize
    sub = _sublane_multiple(mm_dtype)

    budget = int(0.75 * vmem_cap)
    if tm is None:
        tm = _choose_tm(M, D, th, budget, x_item, w_item, out_item, sub)
    tm_eff = max(sub, _round_up(min(tm, _round_up(M, sub)), sub))

    footprint = _tile_footprint(tm_eff, th, D, x_item, w_item, out_item)
    if vmem_limit_bytes is None:
        vmem_limit_bytes = min(vmem_cap, max(int(1.25 * footprint), 32 << 20))

    n_tok_tiles = pl.cdiv(M, tm_eff)
    grid = (n_tok_tiles, Hp // th)           # partial last token tile is fine (rows indep.)

    # Weights are re-streamed once per token tile -> scale their bytes by grid[0].
    cost = pl.CostEstimate(
        flops=6 * M * D * Hp,
        transcendentals=M * Hp,
        bytes_accessed=(M * D * x_item
                        + M * D * out_item
                        + n_tok_tiles * 3 * D * Hp * w_item
                        + n_tok_tiles * (2 * Hp + D) * 4),
    )

    kernel = functools.partial(_swiglu_kernel, th=th)

    out = pl.pallas_call(
        kernel,
        out_shape=jax.ShapeDtypeStruct((M, D), out_dtype),
        grid_spec=pltpu.PrefetchScalarGridSpec(
            num_scalar_prefetch=0,
            grid=grid,
            in_specs=[
                pl.BlockSpec((tm_eff, D), lambda i, j: (i, 0)),   # x tile (resident over j)
                pl.BlockSpec((D, 2 * th), lambda i, j: (0, j)),   # fused gate W tile
                pl.BlockSpec((1, 2 * th), lambda i, j: (0, j)),   # fused gate b tile
                pl.BlockSpec((th, D), lambda i, j: (j, 0)),       # out-proj W tile
                pl.BlockSpec((1, D), lambda i, j: (0, 0)),        # out-proj b
            ],
            out_specs=pl.BlockSpec((tm_eff, D), lambda i, j: (i, 0)),
            scratch_shapes=[pltpu.VMEM((tm_eff, D), jnp.float32)],
        ),
        compiler_params=pltpu.CompilerParams(
            dimension_semantics=("parallel", "arbitrary"),
            vmem_limit_bytes=int(vmem_limit_bytes)),
        cost_estimate=cost,
    )(xm, params["w_gate"], params["b_gate"], params["w_out"], params["b_out"])

    return out.reshape(orig_shape)


def swiglu_ref(x, w_gate, b_gate, w_out, b_out):
    """Pure-JAX reference matching the PyTorch forward (f32)."""
    proj = x @ w_gate.T + b_gate
    h, g = jnp.split(proj, 2, axis=-1)
    act = h * (g * jax.nn.sigmoid(g))
    return act @ w_out.T + b_out


if __name__ == "__main__":
    # Small shapes consistent with the module: batch=2, seq=8, modelDim=32, mlpDim=64.
    batch, seq, model_dim, mlp_dim = 2, 8, 32, 64

    key = jax.random.PRNGKey(0)
    kx, k1, k2, k3, k4 = jax.random.split(key, 5)

    # nn.Linear-style init (uniform +/- 1/sqrt(fan_in)).
    lim_g = 1.0 / math.sqrt(model_dim)
    lim_o = 1.0 / math.sqrt(mlp_dim)
    w_gate = jax.random.uniform(k1, (2 * mlp_dim, model_dim), jnp.float32, -lim_g, lim_g)
    b_gate = jax.random.uniform(k2, (2 * mlp_dim,), jnp.float32, -lim_g, lim_g)
    w_out = jax.random.uniform(k3, (model_dim, mlp_dim), jnp.float32, -lim_o, lim_o)
    b_out = jax.random.uniform(k4, (model_dim,), jnp.float32, -lim_o, lim_o)

    x = jax.random.normal(kx, (batch, seq, model_dim), jnp.float32)
    y_ref = swiglu_ref(x, w_gate, b_gate, w_out, b_out)

    # 1) f32 matmul path: tight correctness check.
    params_f32 = prepare_swiglu_params(w_gate, b_gate, w_out, b_out,
                                       matmul_dtype=jnp.float32)
    y32 = jax.block_until_ready(swiglu_pallas(x, params_f32))
    assert y32.shape == (batch, seq, model_dim)
    assert jnp.allclose(y32, y_ref, atol=1e-5, rtol=1e-5), "f32 mismatch vs reference"

    # 2) bf16 matmul path (performance default): loose check vs f32 reference.
    params_bf16 = prepare_swiglu_params(w_gate, b_gate, w_out, b_out,
                                        matmul_dtype=jnp.bfloat16)
    y16 = jax.block_until_ready(swiglu_pallas(x, params_bf16))
    assert y16.shape == (batch, seq, model_dim)
    assert jnp.allclose(y16.astype(jnp.float32), y_ref, atol=5e-2, rtol=5e-2), \
        "bf16 mismatch vs reference"

    # Dropout with p=0.0 is the identity (module default); nothing to fuse.
    print("KERNEL_OK")
</pallas_src>

<mosaic_0001>
module attributes {stable_mosaic.version = 11 : i64} {
  func.func @_swiglu_kernel(%arg0: i32, %arg1: i32, %arg2: memref<16x32xf32, #tpu.memory_space<vmem>>, %arg3: memref<32x128xf32, #tpu.memory_space<vmem>>, %arg4: memref<1x128xf32, #tpu.memory_space<vmem>>, %arg5: memref<64x32xf32, #tpu.memory_space<vmem>>, %arg6: memref<1x32xf32, #tpu.memory_space<vmem>>, %arg7: memref<16x32xf32, #tpu.memory_space<vmem>>, %arg8: memref<16x32xf32, #tpu.memory_space<vmem>>) attributes {dimension_semantics = [#tpu.dimension_semantics<parallel>, #tpu.dimension_semantics<arbitrary>], iteration_bounds = array<i64: 1, 1>, scalar_prefetch = 0 : i64, scratch_operands = 1 : i64, tpu.core_type = #tpu.core_type<tc>, window_params = [{transform_indices = @transform_0, window_bounds = array<i64: 16, 32>}, {transform_indices = @transform_1, window_bounds = array<i64: 32, 128>}, {transform_indices = @transform_2, window_bounds = array<i64: 1, 128>}, {transform_indices = @transform_3, window_bounds = array<i64: 64, 32>}, {pipeline_mode = #tpu.pipeline_mode<synchronous>, transform_indices = @transform_4, window_bounds = array<i64: 1, 32>}, {transform_indices = @transform_5, window_bounds = array<i64: 16, 32>}]} {
    %c0_i32 = arith.constant 0 : i32
    %0 = arith.cmpi eq, %arg1, %c0_i32 : i32
    %1 = arith.extui %0 : i1 to i32
    %c0_i32_0 = arith.constant 0 : i32
    %2 = arith.cmpi ne, %1, %c0_i32_0 : i32
    scf.if %2 {
      %cst_16 = arith.constant 0.000000e+00 : f32
      %26 = vector.broadcast %cst_16 : f32 to vector<16x32xf32>
      %c0_17 = arith.constant 0 : index
      %c0_18 = arith.constant 0 : index
      %27 = vector.load %arg8[%c0_17, %c0_18] : memref<16x32xf32, #tpu.memory_space<vmem>>, vector<16x32xf32>
      tpu.vector_store %arg8[%c0_17, %c0_18], %26 {strides = array<i32>} : memref<16x32xf32, #tpu.memory_space<vmem>>, vector<16x32xf32>,
    } else {
    }
    %c0 = arith.constant 0 : index
    %c0_1 = arith.constant 0 : index
    %3 = vector.load %arg2[%c0, %c0_1] : memref<16x32xf32, #tpu.memory_space<vmem>>, vector<16x32xf32>
    %c0_2 = arith.constant 0 : index
    %c0_3 = arith.constant 0 : index
    %4 = vector.load %arg3[%c0_2, %c0_3] : memref<32x128xf32, #tpu.memory_space<vmem>>, vector<32x128xf32>
    %cst = arith.constant dense<0.000000e+00> : vector<16x128xf32>
    %5 = tpu.matmul %3, %4, %cst {dimension_numbers = #tpu.dot_dimension_numbers<[1], [0], [0], [1], [0, 0, 1, 1], [], []>} : vector<16x32xf32>, vector<32x128xf32>, vector<16x128xf32> -> vector<16x128xf32>
    %c0_4 = arith.constant 0 : index
    %c0_5 = arith.constant 0 : index
    %6 = vector.load %arg4[%c0_4, %c0_5] : memref<1x128xf32, #tpu.memory_space<vmem>>, vector<1x128xf32>
    %7 = vector.broadcast %6 : vector<1x128xf32> to vector<16x128xf32>
    %8 = arith.addf %5, %7 : vector<16x128xf32>
    %9 = vector.extract_strided_slice %8 {offsets = [0, 0], sizes = [16, 64], strides = [1, 1]} : vector<16x128xf32> to vector<16x64xf32>
    %10 = vector.extract_strided_slice %8 {offsets = [0, 64], sizes = [16, 64], strides = [1, 1]} : vector<16x128xf32> to vector<16x64xf32>
    %11 = arith.negf %10 : vector<16x64xf32>
    %12 = math.exp %11 : vector<16x64xf32>
    %cst_6 = arith.constant 1.000000e+00 : f32
    %13 = vector.broadcast %cst_6 : f32 to vector<16x64xf32>
    %14 = arith.addf %13, %12 : vector<16x64xf32>
    %15 = arith.divf %13, %14 : vector<16x64xf32>
    %16 = arith.mulf %10, %15 : vector<16x64xf32>
    %17 = arith.mulf %9, %16 : vector<16x64xf32>
    %c0_7 = arith.constant 0 : index
    %c0_8 = arith.constant 0 : index
    %18 = vector.load %arg8[%c0_7, %c0_8] : memref<16x32xf32, #tpu.memory_space<vmem>>, vector<16x32xf32>
    %c0_9 = arith.constant 0 : index
    %c0_10 = arith.constant 0 : index
    %19 = vector.load %arg5[%c0_9, %c0_10] : memref<64x32xf32, #tpu.memory_space<vmem>>, vector<64x32xf32>
    %cst_11 = arith.constant dense<0.000000e+00> : vector<16x32xf32>
    %20 = tpu.matmul %17, %19, %cst_11 {dimension_numbers = #tpu.dot_dimension_numbers<[1], [0], [0], [1], [0, 0, 1, 1], [], []>} : vector<16x64xf32>, vector<64x32xf32>, vector<16x32xf32> -> vector<16x32xf32>
    %21 = arith.addf %18, %20 : vector<16x32xf32>
    %c0_12 = arith.constant 0 : index
    %c0_13 = arith.constant 0 : index
    %22 = vector.load %arg8[%c0_12, %c0_13] : memref<16x32xf32, #tpu.memory_space<vmem>>, vector<16x32xf32>
    tpu.vector_store %arg8[%c0_12, %c0_13], %21 {strides = array<i32>} : memref<16x32xf32, #tpu.memory_space<vmem>>, vector<16x32xf32>,
    %c0_i32_14 = arith.constant 0 : i32
    %23 = arith.cmpi eq, %arg1, %c0_i32_14 : i32
    %24 = arith.extui %23 : i1 to i32
    %c0_i32_15 = arith.constant 0 : i32
    %25 = arith.cmpi ne, %24, %c0_i32_15 : i32
    scf.if %25 {
      %c0_16 = arith.constant 0 : index
      %c0_17 = arith.constant 0 : index
      %26 = vector.load %arg8[%c0_16, %c0_17] : memref<16x32xf32, #tpu.memory_space<vmem>>, vector<16x32xf32>
      %c0_18 = arith.constant 0 : index
      %c0_19 = arith.constant 0 : index
      %27 = vector.load %arg6[%c0_18, %c0_19] : memref<1x32xf32, #tpu.memory_space<vmem>>, vector<1x32xf32>
      %28 = vector.broadcast %27 : vector<1x32xf32> to vector<16x32xf32>
      %29 = arith.addf %26, %28 : vector<16x32xf32>
      %c0_20 = arith.constant 0 : index
      %c0_21 = arith.constant 0 : index
      %30 = vector.load %arg7[%c0_20, %c0_21] : memref<16x32xf32, #tpu.memory_space<vmem>>, vector<16x32xf32>
      tpu.vector_store %arg7[%c0_20, %c0_21], %29 {strides = array<i32>} : memref<16x32xf32, #tpu.memory_space<vmem>>, vector<16x32xf32>,
    } else {
    }
    return
  }
  func.func @transform_0(%arg0: i32, %arg1: i32) -> (i32, i32) {
    %c0_i32 = arith.constant 0 : i32
    %c0_i32_0 = arith.constant 0 : i32
    return %arg0, %c0_i32 : i32, i32
  }
  func.func @transform_1(%arg0: i32, %arg1: i32) -> (i32, i32) {
    %c0_i32 = arith.constant 0 : i32
    %c0_i32_0 = arith.constant 0 : i32
    return %c0_i32, %arg1 : i32, i32
  }
  func.func @transform_2(%arg0: i32, %arg1: i32) -> (i32, i32) {
    %c0_i32 = arith.constant 0 : i32
    %c0_i32_0 = arith.constant 0 : i32
    return %c0_i32, %arg1 : i32, i32
  }
  func.func @transform_3(%arg0: i32, %arg1: i32) -> (i32, i32) {
    %c0_i32 = arith.constant 0 : i32
    %c0_i32_0 = arith.constant 0 : i32
    return %arg1, %c0_i32 : i32, i32
  }
  func.func @transform_4(%arg0: i32, %arg1: i32) -> (i32, i32) {
    %c0_i32 = arith.constant 0 : i32
    %c0_i32_0 = arith.constant 0 : i32
    %c0_i32_1 = arith.constant 0 : i32
    return %c0_i32, %c0_i32_0 : i32, i32
  }
  func.func @transform_5(%arg0: i32, %arg1: i32) -> (i32, i32) {
    %c0_i32 = arith.constant 0 : i32
    %c0_i32_0 = arith.constant 0 : i32
    return %arg0, %c0_i32 : i32, i32
  }
}

</mosaic_0001>

<bundles_post_ra>
// kernel: tpu_custom_call.1
= control target key start
LH: loop header
LB: loop body
LE: loop exit
PB: predicated region body
PF: predicated region fallthrough
CT: control target
= control target key end

     0   :  { %vm25_vm0 = vcmask 261120   ;;  %s458_s0 = inlined_call_operand.vmem [shape: f32[16,32], index: 0, kind: input, shape index: {}]   ;;  %s459_s1 = inlined_call_operand.vmem [shape: f32[32,128], index: 1, kind: input, shape index: {}]   ;;  %s460_s2 = inlined_call_operand.vmem [shape: f32[1,128], index: 2, kind: input, shape index: {}]   ;;  %s461_s3 = inlined_call_operand.vmem [shape: f32[64,32], index: 3, kind: input, shape index: {}]   ;;  %s462_s4 = inlined_call_operand.vmem [shape: f32[1,32], index: 4, kind: input, shape index: {}]   ;;  %s463_s5 = inlined_call_operand.hbm [shape: f32[16,32], index: 5, kind: output, shape index: {}]  }
   0x1   :  { %v33_v0 = vld [vmem:[%s459_s1 + $0x18] sm:$0xff]  ;;  %v32_v1 = vld [vmem:[%s459_s1 + $0x10] sm:$0xff]  ;;  %v28_v2 = vld [vmem:[%s458_s0] sm:$0xff] }
   0x2   :  { %299 = vmatprep.subr.mxu0 %v33_v0  ;;  %v31_v3 = vld [vmem:[%s459_s1 + $0x8] sm:$0xff]  ;;  %307 = vmatprep.mubr.msk.f32.mxu0 %vm25_vm0, %v28_v2 }
   0x3   :  { %300 = vmatpush3.msra.mxu0 %v33_v0 }
   0x4   :  { %10 = vsyncpa [#allocation4], 0  ;;  %301 = vmatprep.subr.mxu0 %v32_v1  ;;  %v30_v4 = vld [vmem:[%s459_s1] sm:$0xff]  ;;  %v29_v5 = vld [vmem:[%s458_s0 + $0x8] sm:$0xff]  ;;  %v364_v25 = vmov 0.0   ;;  %s365_s20 = smov 64  }
   0x5   :  { %302 = vmatpush3.msra.mxu0 %v32_v1  ;;  %v156_v6 = vld [vmem:[%s461_s3 + $0x38] sm:$0xff]  ;;  %v155_v7 = vld [vmem:[%s461_s3 + $0x30] sm:$0xff]  ;;  %v154_v8 = vld [vmem:[%s461_s3 + $0x28] sm:$0xff]  ;;  %27 = vst.msk [vmem:[#allocation2 + $0x8] sm:$0xff] %vm25_vm0, %v364_v25  ;;  %vm157_vm1 = vcmask 523264   ;;  %s366_s22 = smov [#allocation3]  }
   0x6   :  { %303 = vmatprep.subr.mxu0 %v31_v3  ;;  %310 = vmatprep.subr.mxu1 %v156_v6  ;;  %v153_v9 = vld [vmem:[%s461_s3 + $0x20] sm:$0xff]  ;;  %v152_v10 = vld [vmem:[%s461_s3 + $0x18] sm:$0xff]  ;;  %v151_v22 = vld [vmem:[%s461_s3 + $0x10] sm:$0xff]  ;;  %26 = vst.msk [vmem:[#allocation2] sm:$0xff] %vm25_vm0, %v364_v25  ;;  %s264_s23 = sshll.u32 %s366_s22, 4  ;;  %s265_s23 = int_to_ptr.vmem [resolvable:$true] %s264_s23 }
   0x7   :  { %304 = vmatpush3.msra.mxu0 %v31_v3  ;;  %311 = vmatpush3.msra.mxu1 %v156_v6  ;;  %v275_v11 = vld [vmem:[%s460_s2] ss:$0 sm:$0xff]  ;;  %v150_v23 = vld [vmem:[%s461_s3 + $0x8] sm:$0xff]  ;;  %s342_s24 = scalar_lea.vmem %s265_s23, 256  ;;  %p347_p1 = scmp.lt.s32.totalorder %s265_s23, %s265_s23 }
   0x8   :  { %305 = vmatprep.subr.mxu0 %v30_v4  ;;  %312 = vmatprep.subr.mxu1 %v155_v7  ;;  %v149_v24 = vld [vmem:[%s461_s3] sm:$0xff]  ;;  %p343_p0 = scmp.ne.s32.totalorder %s265_s23, %s342_s24  ;;  %p348_p2 = scmp.lt.s32.totalorder %s342_s24, %s342_s24 }
   0x9   :  { %306 = vmatpush3.msra.mxu0 %v30_v4  ;;  %313 = vmatpush3.msra.mxu1 %v155_v7  ;;  %v282_v40 = vld [vmem:[%s462_s4] ss:$0 sm:$0xff] }
   0xa   :  { %308 = vmatmul.mubr.msk.f32.vlgmr.msra.gmra.mxu0 %vm25_vm0, %v29_v5  ;;  %314 = vmatprep.subr.mxu1 %v154_v8  ;;  %p349_p3 = por %p348_p2, %p347_p1 }
   0xb   :  { %315 = vmatpush3.msra.mxu1 %v154_v8 }
   0xc   :  { %316 = vmatprep.subr.mxu1 %v153_v9  ;;  %v148_v34 = vld [vmem:[#allocation2 + $0x8] sm:$0xff]  ;;  %p350_p4 = pnand %p349_p3, %p343_p0 }
   0xd   :  { %317 = vmatpush3.msra.mxu1 %v153_v9  ;;  %v147_v36 = vld [vmem:[#allocation2] sm:$0xff] }
   0xe   :  { %318 = vmatprep.subr.mxu1 %v152_v10 }
   0xf   :  { %319 = vmatpush3.msra.mxu1 %v152_v10 }
  0x10   :  { %320 = vmatprep.subr.mxu1 %v151_v22 }
  0x11   :  { %321 = vmatpush3.msra.mxu1 %v151_v22 }
  0x12   :  { %322 = vmatprep.subr.mxu1 %v150_v23 }
  0x13   :  { %323 = vmatpush3.msra.mxu1 %v150_v23 }
  0x14   :  { %324 = vmatprep.subr.mxu1 %v149_v24 }
  0x15   :  { %325 = vmatpush3.msra.mxu1 %v149_v24 }
  0xca   :  { %v309_v12 = vpop.f32.mrf.mxu0 }
  0xcb   :  { %v120_v13 = vadd.f32 %v309_v12, %v275_v11 }
  0xcc   :  { %v114_v14 = vpop.f32.mrf.mxu0 }
  0xcd   :  { %v279_v15 = vmul.f32 -1.442695, %v120_v13  ;;  %v115_v16 = vadd.f32 %v275_v11, %v114_v14 }
  0xcf   :  { %334 = vpow2.f32 %v279_v15  ;;  %v278_v17 = vmul.f32 -1.442695, %v115_v16 }
  0xd1   :  { %336 = vpow2.f32 %v278_v17 }
  0xdc   :  { %v335_v18 = vpop.eup %334 }
  0xdd   :  { %v130_v20 = vadd.f32 1.0, %v335_v18 }
  0xde   :  { %v337_v19 = vpop.eup %336 }
  0xdf   :  { %v129_v21 = vadd.f32 1.0, %v337_v19 }
  0xe1   :  { %338 = vrcp.f32 %v129_v21 }
  0xe2   :  { %340 = vrcp.f32 %v130_v20 }
  0xee   :  { %v339_v26 = vpop.eup %338 }
  0xef   :  { %v135_v27 = vmul.f32 %v339_v26, %v115_v16  ;;  %v341_v28 = vpop.eup %340 }
  0xf0   :  { %v136_v29 = vmul.f32 %v341_v28, %v120_v13 }
  0xf1   :  { %139 = vrot.lane.b32.xlu0 %v135_v27, %s365_s20 }
  0xf5   :  { %141 = vrot.lane.b32.xlu0 %v136_v29, %s365_s20 }
 0x163   :  { %v140_v30 = vpop.permute.xlu0 %139 }
 0x164   :  { %v145_v31 = vmul.f32 %v140_v30, %v115_v16 }
 0x166   :  { %326 = vmatprep.mubr.msk.f32.mxu1 %vm157_vm1, %v145_v31 }
 0x167   :  { %v142_v32 = vpop.permute.xlu0 %141 }
 0x168   :  { %v146_v33 = vmul.f32 %v142_v32, %v120_v13 }
 0x16a   :  { %327 = vmatmul.mubr.msk.f32.vlgmr.msra.gmra.mxu1 %vm157_vm1, %v146_v33 }
 0x22a   :  { %v328_v35 = vpop.f32.mrf.mxu1 }
 0x22b   :  { %v240_v37 = vadd.f32 %v328_v35, %v148_v34 }
 0x22c   :  { %v230_v38 = vpop.f32.mrf.mxu1 }
 0x22d   :  { %242 = vst.msk [vmem:[#allocation2 + $0x8] sm:$0xff] %vm25_vm0, %v240_v37  ;;  %v239_v39 = vadd.f32 %v230_v38, %v147_v36 }
 0x22f   :  { %241 = vst.msk [vmem:[#allocation2] sm:$0xff] %vm25_vm0, %v239_v39 }
 0x234   :  { %v247_v41 = vld [vmem:[#allocation2 + $0x8] sm:$0xff] }
 0x235   :  { %v256_v42 = vadd.f32 %v282_v40, %v247_v41 }
 0x236   :  { %v246_v43 = vld [vmem:[#allocation2] sm:$0xff] }
 0x237   :  { %v255_v44 = vadd.f32 %v282_v40, %v246_v43  ;;  %258 = vst.msk [vmem:[#allocation3 + $0x8] sm:$0xff] %vm25_vm0, %v256_v42 }
 0x239   :  { %257 = vst.msk [vmem:[#allocation3] sm:$0xff] %vm25_vm0, %v255_v44 }
 0x23a   :  { %353 = shalt.err (!%p350_p4)
}
 0x23b   :  { %s367_s25 = smov 128   ;;  %s368_s4 = smov 8  }
 0x23c   :  { %270 = dma.vmem_to_hbm [thread:$0]  %s265_s23, 256, %s463_s5, [#allocation4], %s367_s25, %s367_s25, %s368_s4  }
 0x23d   :  { %362 = dma.done.wait [#allocation4], 256  }
 0x23e   :  { %363 = vsyncadd [#allocation4], 4294967040 }
 0x23f   :  { %274 = vsyncpa [#allocation4], 1 }

</bundles_post_ra>
